<compile_context>
chip_gen: v5e
topology: v5e:2x2
jax: 0.10.0
libtpu: 0.0.40
codegen_flags: <defaults>
</compile_context>

<pallas_src>
import jax
import jax.numpy as jnp
from jax.experimental import pallas as pl
from jax.experimental.pallas import tpu as pltpu

EMB_DIM = 512   # FaceNet embedding size
HIDDEN = 256    # k in the PyTorch module


def _age_head_kernel(emb_ref, w_ref, mask_ref, wfc_ref, bfc_ref,
                     wh_ref, bhc_ref, out_ref):
    neg_slope = 0.01  # F.leaky_relu default

    # base_embedding = leaky_relu(FaceNet(x))  (embedding stands in for FaceNet)
    e = emb_ref[...]                                  # (Bt, 512) f32
    e = jnp.maximum(e, neg_slope * e)                 # leaky_relu via mul+max

    # x = leaky_relu(fc_regress(e)) : bf16 operands into the MXU, f32 accumulate
    x = jnp.dot(e.astype(jnp.bfloat16), wfc_ref[...],
                preferred_element_type=jnp.float32) + bfc_ref[...]
    x = jnp.maximum(x, neg_slope * x)

    # Dropout(p): pre-scaled keep mask (1/(1-p) on kept units, 0 on dropped).
    x = x * mask_ref[...]

    # All per-class regression heads fused into one (256, C) matmul;
    # head biases + class centers are pre-folded into a single (1, C) constant.
    heads = jnp.dot(x.astype(jnp.bfloat16), wh_ref[...],
                    preferred_element_type=jnp.float32) + bhc_ref[...]

    # result = sum_i (head_i + center_i) * weights[:, i] / sum_j weights[:, j]
    w = w_ref[...]                                    # (Bt, C)
    num = jnp.sum(heads * w, axis=1, keepdims=True)   # (Bt, 1)
    den = jnp.sum(w, axis=1, keepdims=True)           # (Bt, 1)
    out_ref[...] = num / den


def _pick_batch_tile(batch):
    # Largest sublane-aligned tile (<=512 rows) that evenly divides the batch;
    # otherwise fall back to the whole batch as a single tile.
    for bt in (512, 256, 128, 64, 32, 16, 8):
        if batch % bt == 0:
            return bt
    return batch


def age_multihead_regressor(embedding, weights, params, dropout_key, p=0.5):
    """embedding: (B, 512) f32, weights: (B, num_classes) f32."""
    B, emb_dim = embedding.shape
    C = weights.shape[1]
    hidden = params["W_fc"].shape[1]

    # Dropout keep mask, generated per call (caller varies dropout_key per step).
    if p > 0.0:
        keep = jax.random.bernoulli(dropout_key, 1.0 - p, (B, hidden))
        mask = keep.astype(jnp.float32) * (1.0 / (1.0 - p))
    else:
        mask = jnp.ones((B, hidden), jnp.float32)

    bt = _pick_batch_tile(B)
    grid = (B // bt,)

    out = pl.pallas_call(
        _age_head_kernel,
        out_shape=jax.ShapeDtypeStruct((B, 1), jnp.float32),
        grid=grid,
        in_specs=[
            # per-tile (double-buffered across the batch grid)
            pl.BlockSpec((bt, emb_dim), lambda i: (i, 0)),   # embedding
            pl.BlockSpec((bt, C),       lambda i: (i, 0)),   # mixture weights
            pl.BlockSpec((bt, hidden),  lambda i: (i, 0)),   # dropout mask
            # resident in VMEM across all batch tiles
            pl.BlockSpec((emb_dim, hidden), lambda i: (0, 0)),  # W_fc (bf16)
            pl.BlockSpec((1, hidden),       lambda i: (0, 0)),  # b_fc
            pl.BlockSpec((hidden, C),       lambda i: (0, 0)),  # W_heads (bf16)
            pl.BlockSpec((1, C),            lambda i: (0, 0)),  # b_heads+centers
        ],
        out_specs=pl.BlockSpec((bt, 1), lambda i: (i, 0)),
        compiler_params=pltpu.CompilerParams(
            dimension_semantics=("parallel",)),
    )(embedding, weights, mask,
      params["W_fc"], params["b_fc"], params["W_heads"], params["b_heads_centers"])

    # torch.squeeze of the stacked (B, 1) head outputs -> (B,)
    return jnp.squeeze(out, axis=1)


def init_params(key, num_classes, age_interval, min_age):
    k1, k2, k3, k4 = jax.random.split(key, 4)
    s_fc = 1.0 / jnp.sqrt(jnp.float32(EMB_DIM))
    s_h = 1.0 / jnp.sqrt(jnp.float32(HIDDEN))
    centers = jnp.asarray(
        [min_age + 0.5 * age_interval + i * age_interval for i in range(num_classes)],
        dtype=jnp.float32,
    ).reshape(1, num_classes)
    b_heads = jax.random.uniform(k4, (1, num_classes), jnp.float32, -1.0, 1.0) * s_h
    return {
        # stored as (in, out) == nn.Linear.weight.T, in bf16 for the MXU path
        "W_fc": (jax.random.uniform(k1, (EMB_DIM, HIDDEN), jnp.float32, -1.0, 1.0)
                 * s_fc).astype(jnp.bfloat16),
        "b_fc": jax.random.uniform(k2, (1, HIDDEN), jnp.float32, -1.0, 1.0) * s_fc,
        "W_heads": (jax.random.uniform(k3, (HIDDEN, num_classes), jnp.float32, -1.0, 1.0)
                    * s_h).astype(jnp.bfloat16),
        # per-head biases and class centers folded into one (1, C) constant
        "b_heads_centers": b_heads + centers,
    }


if __name__ == "__main__":
    num_classes = 10
    age_interval = 10.0
    min_age = 0.0

    B = 8
    key = jax.random.PRNGKey(0)
    k_emb, k_w, k_params, k_drop = jax.random.split(key, 4)

    # Embedding stands in for FaceNet(input_images) output (see TODO above).
    embedding = jax.random.normal(k_emb, (B, EMB_DIM), dtype=jnp.float32)
    # Per-class mixture weights (positive, as produced by an upstream classifier).
    weights = jax.random.uniform(k_w, (B, num_classes), jnp.float32, 0.05, 1.0)

    params = init_params(k_params, num_classes, age_interval, min_age)

    result = age_multihead_regressor(embedding, weights, params, k_drop, p=0.5)
    result = jax.block_until_ready(result)
    assert result.shape == (B,)
    assert bool(jnp.all(jnp.isfinite(result)))
    print("KERNEL_OK")
</pallas_src>

<mosaic_0001>
module attributes {stable_mosaic.version = 11 : i64} {
  func.func @_age_head_kernel(%arg0: i32, %arg1: memref<8x512xf32, #tpu.memory_space<vmem>>, %arg2: memref<8x10xf32, #tpu.memory_space<vmem>>, %arg3: memref<8x256xf32, #tpu.memory_space<vmem>>, %arg4: memref<512x256xbf16, #tpu.memory_space<vmem>>, %arg5: memref<1x256xf32, #tpu.memory_space<vmem>>, %arg6: memref<256x10xbf16, #tpu.memory_space<vmem>>, %arg7: memref<1x10xf32, #tpu.memory_space<vmem>>, %arg8: memref<8x1xf32, #tpu.memory_space<vmem>>) attributes {dimension_semantics = [#tpu.dimension_semantics<parallel>], iteration_bounds = array<i64: 1>, scalar_prefetch = 0 : i64, scratch_operands = 0 : i64, tpu.core_type = #tpu.core_type<tc>, window_params = [{transform_indices = @transform_0, window_bounds = array<i64: 8, 512>}, {transform_indices = @transform_1, window_bounds = array<i64: 8, 10>}, {transform_indices = @transform_2, window_bounds = array<i64: 8, 256>}, {pipeline_mode = #tpu.pipeline_mode<synchronous>, transform_indices = @transform_3, window_bounds = array<i64: 512, 256>}, {pipeline_mode = #tpu.pipeline_mode<synchronous>, transform_indices = @transform_4, window_bounds = array<i64: 1, 256>}, {pipeline_mode = #tpu.pipeline_mode<synchronous>, transform_indices = @transform_5, window_bounds = array<i64: 256, 10>}, {pipeline_mode = #tpu.pipeline_mode<synchronous>, transform_indices = @transform_6, window_bounds = array<i64: 1, 10>}, {transform_indices = @transform_7, window_bounds = array<i64: 8, 1>}]} {
    %c0 = arith.constant 0 : index
    %c0_0 = arith.constant 0 : index
    %0 = vector.load %arg1[%c0, %c0_0] : memref<8x512xf32, #tpu.memory_space<vmem>>, vector<8x512xf32>
    %cst = arith.constant 0.00999999977 : f32
    %1 = vector.broadcast %cst : f32 to vector<8x512xf32>
    %2 = arith.mulf %1, %0 : vector<8x512xf32>
    %3 = arith.maximumf %0, %2 : vector<8x512xf32>
    %4 = arith.truncf %3 : vector<8x512xf32> to vector<8x512xbf16>
    %c0_1 = arith.constant 0 : index
    %c0_2 = arith.constant 0 : index
    %5 = vector.load %arg4[%c0_1, %c0_2] : memref<512x256xbf16, #tpu.memory_space<vmem>>, vector<512x256xbf16>
    %cst_3 = arith.constant dense<0.000000e+00> : vector<8x256xf32>
    %6 = tpu.matmul %4, %5, %cst_3 {dimension_numbers = #tpu.dot_dimension_numbers<[1], [0], [0], [1], [0, 0, 1, 1], [], []>} : vector<8x512xbf16>, vector<512x256xbf16>, vector<8x256xf32> -> vector<8x256xf32>
    %c0_4 = arith.constant 0 : index
    %c0_5 = arith.constant 0 : index
    %7 = vector.load %arg5[%c0_4, %c0_5] : memref<1x256xf32, #tpu.memory_space<vmem>>, vector<1x256xf32>
    %8 = vector.broadcast %7 : vector<1x256xf32> to vector<8x256xf32>
    %9 = arith.addf %6, %8 : vector<8x256xf32>
    %cst_6 = arith.constant 0.00999999977 : f32
    %10 = vector.broadcast %cst_6 : f32 to vector<8x256xf32>
    %11 = arith.mulf %10, %9 : vector<8x256xf32>
    %12 = arith.maximumf %9, %11 : vector<8x256xf32>
    %c0_7 = arith.constant 0 : index
    %c0_8 = arith.constant 0 : index
    %13 = vector.load %arg3[%c0_7, %c0_8] : memref<8x256xf32, #tpu.memory_space<vmem>>, vector<8x256xf32>
    %14 = arith.mulf %12, %13 : vector<8x256xf32>
    %15 = arith.truncf %14 : vector<8x256xf32> to vector<8x256xbf16>
    %c0_9 = arith.constant 0 : index
    %c0_10 = arith.constant 0 : index
    %16 = vector.load %arg6[%c0_9, %c0_10] : memref<256x10xbf16, #tpu.memory_space<vmem>>, vector<256x10xbf16>
    %cst_11 = arith.constant dense<0.000000e+00> : vector<8x10xf32>
    %17 = tpu.matmul %15, %16, %cst_11 {dimension_numbers = #tpu.dot_dimension_numbers<[1], [0], [0], [1], [0, 0, 1, 1], [], []>} : vector<8x256xbf16>, vector<256x10xbf16>, vector<8x10xf32> -> vector<8x10xf32>
    %c0_12 = arith.constant 0 : index
    %c0_13 = arith.constant 0 : index
    %18 = vector.load %arg7[%c0_12, %c0_13] : memref<1x10xf32, #tpu.memory_space<vmem>>, vector<1x10xf32>
    %19 = vector.broadcast %18 : vector<1x10xf32> to vector<8x10xf32>
    %20 = arith.addf %17, %19 : vector<8x10xf32>
    %c0_14 = arith.constant 0 : index
    %c0_15 = arith.constant 0 : index
    %21 = vector.load %arg2[%c0_14, %c0_15] : memref<8x10xf32, #tpu.memory_space<vmem>>, vector<8x10xf32>
    %22 = arith.mulf %20, %21 : vector<8x10xf32>
    %cst_16 = arith.constant dense<0.000000e+00> : vector<8xf32>
    %23 = vector.multi_reduction <add>, %22, %cst_16 [1] : vector<8x10xf32> to vector<8xf32>
    %24 = vector.shape_cast %23 : vector<8xf32> to vector<8x1xf32>
    %cst_17 = arith.constant dense<0.000000e+00> : vector<8xf32>
    %25 = vector.multi_reduction <add>, %21, %cst_17 [1] : vector<8x10xf32> to vector<8xf32>
    %26 = vector.shape_cast %25 : vector<8xf32> to vector<8x1xf32>
    %27 = arith.divf %24, %26 : vector<8x1xf32>
    %c0_18 = arith.constant 0 : index
    %c0_19 = arith.constant 0 : index
    %28 = vector.load %arg8[%c0_18, %c0_19] : memref<8x1xf32, #tpu.memory_space<vmem>>, vector<8x1xf32>
    tpu.vector_store %arg8[%c0_18, %c0_19], %27 {strides = array<i32>} : memref<8x1xf32, #tpu.memory_space<vmem>>, vector<8x1xf32>,
    return
  }
  func.func @transform_0(%arg0: i32) -> (i32, i32) {
    %c0_i32 = arith.constant 0 : i32
    %c0_i32_0 = arith.constant 0 : i32
    return %arg0, %c0_i32 : i32, i32
  }
  func.func @transform_1(%arg0: i32) -> (i32, i32) {
    %c0_i32 = arith.constant 0 : i32
    %c0_i32_0 = arith.constant 0 : i32
    return %arg0, %c0_i32 : i32, i32
  }
  func.func @transform_2(%arg0: i32) -> (i32, i32) {
    %c0_i32 = arith.constant 0 : i32
    %c0_i32_0 = arith.constant 0 : i32
    return %arg0, %c0_i32 : i32, i32
  }
  func.func @transform_3(%arg0: i32) -> (i32, i32) {
    %c0_i32 = arith.constant 0 : i32
    %c0_i32_0 = arith.constant 0 : i32
    %c0_i32_1 = arith.constant 0 : i32
    return %c0_i32, %c0_i32_0 : i32, i32
  }
  func.func @transform_4(%arg0: i32) -> (i32, i32) {
    %c0_i32 = arith.constant 0 : i32
    %c0_i32_0 = arith.constant 0 : i32
    %c0_i32_1 = arith.constant 0 : i32
    return %c0_i32, %c0_i32_0 : i32, i32
  }
  func.func @transform_5(%arg0: i32) -> (i32, i32) {
    %c0_i32 = arith.constant 0 : i32
    %c0_i32_0 = arith.constant 0 : i32
    %c0_i32_1 = arith.constant 0 : i32
    return %c0_i32, %c0_i32_0 : i32, i32
  }
  func.func @transform_6(%arg0: i32) -> (i32, i32) {
    %c0_i32 = arith.constant 0 : i32
    %c0_i32_0 = arith.constant 0 : i32
    %c0_i32_1 = arith.constant 0 : i32
    return %c0_i32, %c0_i32_0 : i32, i32
  }
  func.func @transform_7(%arg0: i32) -> (i32, i32) {
    %c0_i32 = arith.constant 0 : i32
    %c0_i32_0 = arith.constant 0 : i32
    return %arg0, %c0_i32 : i32, i32
  }
}

</mosaic_0001>

<bundles_post_ra>
// kernel: tpu_custom_call.1
= control target key start
LH: loop header
LB: loop body
LE: loop exit
PB: predicated region body
PF: predicated region fallthrough
CT: control target
= control target key end

     0   :  { %12 = vsyncpa [#allocation3], 0  ;;  %s1183_s27 = smov [#allocation2]   ;;  %s1184_s29 = smov 128   ;;  %s1323_s0 = inlined_call_operand.vmem [shape: f32[8,512], index: 0, kind: input, shape index: {}]   ;;  %s1324_s1 = inlined_call_operand.vmem [shape: f32[8,10], index: 1, kind: input, shape index: {}]   ;;  %s1325_s2 = inlined_call_operand.vmem [shape: f32[8,256], index: 2, kind: input, shape index: {}]   ;;  %s1326_s3 = inlined_call_operand.hbm [shape: bf16[512,256], index: 3, kind: input, shape index: {}]   ;;  %s1327_s4 = inlined_call_operand.vmem [shape: f32[1,256], index: 4, kind: input, shape index: {}]   ;;  %s1328_s5 = inlined_call_operand.vmem [shape: bf16[256,10], index: 5, kind: input, shape index: {}]   ;;  %s1329_s6 = inlined_call_operand.vmem [shape: f32[1,10], index: 6, kind: input, shape index: {}]   ;;  %s1330_s7 = inlined_call_operand.vmem [shape: f32[8,1], index: 7, kind: output, shape index: {}]  }
   0x1   :  { %s23_s26 = sshll.u32 %s1326_s3, 4  ;;  %s25_s28 = sshll.u32 %s1183_s27, 4  ;;  %s24_s26 = int_to_ptr.hbm [resolvable:$true] %s23_s26  ;;  %s26_s28 = int_to_ptr.vmem [resolvable:$true] %s25_s28 }
   0x2   :  { %s1185_s30 = smov 8  }
   0x3   :  { %31 = dma.hbm_to_vmem [thread:$0]  %s24_s26, 8192, %s26_s28, [#allocation3], %s1184_s29, %s1184_s29, %s1185_s30  }
   0x4   :  { %1181 = dma.done.wait [#allocation3], 8192  }
   0x5   :  { %1182 = vsyncadd [#allocation3], 4294959104  ;;  %v809_v0 = vld [vmem:[#allocation2 + $0x70] sm:$0xf]  ;;  %v1086_v1 = vld [vmem:[#allocation2 + $0x74] sm:$0xf0] }
   0x6   :  { %v873_v2 = vld [vmem:[#allocation2 + $0xf0] sm:$0xf]  ;;  %v810_v3 = vor.u32 %v1086_v1, %v809_v0  ;;  %v1102_v4 = vld [vmem:[#allocation2 + $0xf4] sm:$0xf0]  ;;  %v801_v11 = vld [vmem:[#allocation2 + $0x60] sm:$0xf] }
   0x7   :  { %v937_v5 = vld [vmem:[#allocation2 + $0x170] sm:$0xf]  ;;  %v1118_v6 = vld [vmem:[#allocation2 + $0x174] sm:$0xf0]  ;;  %v874_v7 = vor.u32 %v1102_v4, %v873_v2  ;;  %v1084_v13 = vld [vmem:[#allocation2 + $0x64] sm:$0xf0] }
   0x8   :  { %v938_v8 = vor.u32 %v1118_v6, %v937_v5  ;;  %v1001_v9 = vld [vmem:[#allocation2 + $0x1f0] sm:$0xf]  ;;  %v1134_v10 = vld [vmem:[#allocation2 + $0x1f4] sm:$0xf0]  ;;  %448 = vmatpush.bf16.msra.mxu0 %v810_v3  ;;  %v865_v14 = vld [vmem:[#allocation2 + $0xe0] sm:$0xf]  ;;  %v802_v16 = vor.u32 %v1084_v13, %v801_v11 }
   0x9   :  { %v1002_v12 = vor.u32 %v1134_v10, %v1001_v9  ;;  %v1100_v15 = vld [vmem:[#allocation2 + $0xe4] sm:$0xf0]  ;;  %461 = vmatpush.bf16.msra.mxu1 %v874_v7  ;;  %v929_v18 = vld [vmem:[#allocation2 + $0x160] sm:$0xf]  ;;  %v793_v23 = vld [vmem:[#allocation2 + $0x50] sm:$0xf] }
   0xa   :  { %474 = vmatpush.bf16.msra.mxu2 %v938_v8  ;;  %v866_v17 = vor.u32 %v1100_v15, %v865_v14  ;;  %v1116_v19 = vld [vmem:[#allocation2 + $0x164] sm:$0xf0]  ;;  %v993_v20 = vld [vmem:[#allocation2 + $0x1e0] sm:$0xf]  ;;  %v1082_v24 = vld [vmem:[#allocation2 + $0x54] sm:$0xf0] }
   0xb   :  { %487 = vmatpush.bf16.msra.mxu3 %v1002_v12  ;;  %v930_v21 = vor.u32 %v1116_v19, %v929_v18  ;;  %v1132_v22 = vld [vmem:[#allocation2 + $0x1e4] sm:$0xf0]  ;;  %v857_v26 = vld [vmem:[#allocation2 + $0xd0] sm:$0xf]  ;;  %v1098_v27 = vld [vmem:[#allocation2 + $0xd4] sm:$0xf0]  ;;  %v794_v29 = vor.u32 %v1082_v24, %v793_v23 }
   0xc   :  { %v994_v25 = vor.u32 %v1132_v22, %v993_v20  ;;  %v921_v28 = vld [vmem:[#allocation2 + $0x150] sm:$0xf]  ;;  %449 = vmatpush.bf16.msra.mxu0 %v802_v16  ;;  %v1114_v30 = vld [vmem:[#allocation2 + $0x154] sm:$0xf0]  ;;  %v858_v33 = vor.u32 %v1098_v27, %v857_v26  ;;  %v785_v35 = vld [vmem:[#allocation2 + $0x40] sm:$0xf] }
   0xd   :  { %v985_v31 = vld [vmem:[#allocation2 + $0x1d0] sm:$0xf]  ;;  %v1130_v32 = vld [vmem:[#allocation2 + $0x1d4] sm:$0xf0]  ;;  %462 = vmatpush.bf16.msra.mxu1 %v866_v17  ;;  %v922_v34 = vor.u32 %v1114_v30, %v921_v28  ;;  %v1080_v36 = vld [vmem:[#allocation2 + $0x44] sm:$0xf0] }
   0xe   :  { %475 = vmatpush.bf16.msra.mxu2 %v930_v21  ;;  %v849_v37 = vld [vmem:[#allocation2 + $0xc0] sm:$0xf]  ;;  %v986_v38 = vor.u32 %v1130_v32, %v985_v31  ;;  %v1096_v39 = vld [vmem:[#allocation2 + $0xc4] sm:$0xf0]  ;;  %v786_v44 = vor.u32 %v1080_v36, %v785_v35  ;;  %v777_v47 = vld [vmem:[#allocation2 + $0x30] sm:$0xf] }
   0xf   :  { %488 = vmatpush.bf16.msra.mxu3 %v994_v25  ;;  %v913_v40 = vld [vmem:[#allocation2 + $0x140] sm:$0xf]  ;;  %v1112_v41 = vld [vmem:[#allocation2 + $0x144] sm:$0xf0]  ;;  %v850_v45 = vor.u32 %v1096_v39, %v849_v37  ;;  %v1078_v48 = vld [vmem:[#allocation2 + $0x34] sm:$0xf0] }
  0x10   :  { %v977_v42 = vld [vmem:[#allocation2 + $0x1c0] sm:$0xf]  ;;  %v1128_v43 = vld [vmem:[#allocation2 + $0x1c4] sm:$0xf0]  ;;  %450 = vmatpush.bf16.msra.mxu0 %v794_v29  ;;  %v914_v46 = vor.u32 %v1112_v41, %v913_v40  ;;  %v841_v49 = vld [vmem:[#allocation2 + $0xb0] sm:$0xf]  ;;  %v778_v56 = vor.u32 %v1078_v48, %v777_v47 }
  0x11   :  { %463 = vmatpush.bf16.msra.mxu1 %v858_v33  ;;  %v978_v50 = vor.u32 %v1128_v43, %v977_v42  ;;  %v1094_v51 = vld [vmem:[#allocation2 + $0xb4] sm:$0xf0]  ;;  %v905_v52 = vld [vmem:[#allocation2 + $0x130] sm:$0xf]  ;;  %v769_v59 = vld [vmem:[#allocation2 + $0x20] sm:$0xf] }
  0x12   :  { %476 = vmatpush.bf16.msra.mxu2 %v922_v34  ;;  %v1110_v53 = vld [vmem:[#allocation2 + $0x134] sm:$0xf0]  ;;  %v969_v54 = vld [vmem:[#allocation2 + $0x1b0] sm:$0xf]  ;;  %v842_v57 = vor.u32 %v1094_v51, %v841_v49  ;;  %v1076_v60 = vld [vmem:[#allocation2 + $0x24] sm:$0xf0] }
  0x13   :  { %489 = vmatpush.bf16.msra.mxu3 %v986_v38  ;;  %v1126_v55 = vld [vmem:[#allocation2 + $0x1b4] sm:$0xf0]  ;;  %v906_v58 = vor.u32 %v1110_v53, %v905_v52  ;;  %v833_v61 = vld [vmem:[#allocation2 + $0xa0] sm:$0xf]  ;;  %v1092_v63 = vld [vmem:[#allocation2 + $0xa4] sm:$0xf0]  ;;  %v770_v4 = vor.u32 %v1076_v60, %v769_v59 }
  0x14   :  { %451 = vmatpush.bf16.msra.mxu0 %v786_v44  ;;  %v970_v62 = vor.u32 %v1126_v55, %v969_v54  ;;  %v897_v0 = vld [vmem:[#allocation2 + $0x120] sm:$0xf]  ;;  %v1108_v1 = vld [vmem:[#allocation2 + $0x124] sm:$0xf0]  ;;  %v761_v5 = vld [vmem:[#allocation2 + $0x10] sm:$0xf]  ;;  %v834_v6 = vor.u32 %v1092_v63, %v833_v61 }
  0x15   :  { %464 = vmatpush.bf16.msra.mxu1 %v850_v45  ;;  %v961_v2 = vld [vmem:[#allocation2 + $0x1a0] sm:$0xf]  ;;  %v1124_v3 = vld [vmem:[#allocation2 + $0x1a4] sm:$0xf0]  ;;  %v898_v7 = vor.u32 %v1108_v1, %v897_v0  ;;  %v1074_v8 = vld [vmem:[#allocation2 + $0x14] sm:$0xf0] }
  0x16   :  { %477 = vmatpush.bf16.msra.mxu2 %v914_v46  ;;  %v825_v9 = vld [vmem:[#allocation2 + $0x90] sm:$0xf]  ;;  %v1090_v10 = vld [vmem:[#allocation2 + $0x94] sm:$0xf0]  ;;  %v962_v11 = vor.u32 %v1124_v3, %v961_v2  ;;  %v753_v16 = vld [vmem:[#allocation2] sm:$0xf]  ;;  %v762_v18 = vor.u32 %v1074_v8, %v761_v5 }
  0x17   :  { %490 = vmatpush.bf16.msra.mxu3 %v978_v50  ;;  %v889_v12 = vld [vmem:[#allocation2 + $0x110] sm:$0xf]  ;;  %v1106_v13 = vld [vmem:[#allocation2 + $0x114] sm:$0xf0]  ;;  %v1072_v17 = vld [vmem:[#allocation2 + $0x4] sm:$0xf0]  ;;  %v826_v23 = vor.u32 %v1090_v10, %v825_v9 }
  0x18   :  { %452 = vmatpush.bf16.msra.mxu0 %v778_v56  ;;  %v953_v14 = vld [vmem:[#allocation2 + $0x190] sm:$0xf]  ;;  %v1122_v15 = vld [vmem:[#allocation2 + $0x194] sm:$0xf0]  ;;  %v817_v19 = vld [vmem:[#allocation2 + $0x80] sm:$0xf]  ;;  %v890_v24 = vor.u32 %v1106_v13, %v889_v12  ;;  %v754_v35 = vor.u32 %v1072_v17, %v753_v16 }
  0x19   :  { %465 = vmatpush.bf16.msra.mxu1 %v842_v57  ;;  %v1088_v20 = vld [vmem:[#allocation2 + $0x84] sm:$0xf0]  ;;  %v881_v21 = vld [vmem:[#allocation2 + $0x100] sm:$0xf]  ;;  %v1085_v27 = vld [vmem:[#allocation2 + $0x74] sm:$0xf]  ;;  %v954_v28 = vor.u32 %v1122_v15, %v953_v14 }
  0x1a   :  { %478 = vmatpush.bf16.msra.mxu2 %v906_v58  ;;  %v1104_v22 = vld [vmem:[#allocation2 + $0x104] sm:$0xf0]  ;;  %v945_v25 = vld [vmem:[#allocation2 + $0x180] sm:$0xf]  ;;  %v811_v29 = vld [vmem:[#allocation2 + $0x78] sm:$0xf0]  ;;  %v818_v40 = vor.u32 %v1088_v20, %v817_v19 }
  0x1b   :  { %491 = vmatpush.bf16.msra.mxu3 %v970_v62  ;;  %v1120_v26 = vld [vmem:[#allocation2 + $0x184] sm:$0xf0]  ;;  %v1101_v30 = vld [vmem:[#allocation2 + $0xf4] sm:$0xf]  ;;  %v875_v31 = vld [vmem:[#allocation2 + $0xf8] sm:$0xf0]  ;;  %v882_v41 = vor.u32 %v1104_v22, %v881_v21  ;;  %v814_v46 = vor.u32 %v1085_v27, %v811_v29 }
  0x1c   :  { %453 = vmatpush.bf16.msra.mxu0 %v770_v4  ;;  %v1117_v32 = vld [vmem:[#allocation2 + $0x174] sm:$0xf]  ;;  %v939_v33 = vld [vmem:[#allocation2 + $0x178] sm:$0xf0]  ;;  %v42_v38 = vld [vmem:[%s1323_s0] sm:$0xff]  ;;  %v946_v45 = vor.u32 %v1120_v26, %v945_v25  ;;  %v878_v49 = vor.u32 %v1101_v30, %v875_v31  ;;  %vm722_vm0 = vcmask 80896  }
  0x1d   :  { %466 = vmatpush.bf16.msra.mxu1 %v834_v6  ;;  %v44_v34 = vld [vmem:[%s1323_s0 + $0x10] sm:$0xff]  ;;  %v45_v39 = vld [vmem:[%s1323_s0 + $0x18] sm:$0xff]  ;;  %v46_v43 = vmul.f32 0.01, %v42_v38  ;;  %v1083_v47 = vld [vmem:[#allocation2 + $0x64] sm:$0xf]  ;;  %v942_v50 = vor.u32 %v1117_v32, %v939_v33 }
  0x1e   :  { %479 = vmatpush.bf16.msra.mxu2 %v898_v7  ;;  %v1133_v36 = vld [vmem:[#allocation2 + $0x1f4] sm:$0xf]  ;;  %v48_v37 = vmul.f32 0.01, %v44_v34  ;;  %v1003_v42 = vld [vmem:[#allocation2 + $0x1f8] sm:$0xf0] }
  0x1f   :  { %492 = vmatpush.bf16.msra.mxu3 %v962_v11  ;;  %v49_v44 = vmul.f32 0.01, %v45_v39  ;;  %v803_v51 = vld [vmem:[#allocation2 + $0x68] sm:$0xf0]  ;;  %v1099_v52 = vld [vmem:[#allocation2 + $0xe4] sm:$0xf]  ;;  %v50_v54 = vmax.f32 %v42_v38, %v46_v43  ;;  %v1006_v56 = vor.u32 %v1133_v36, %v1003_v42 }
  0x20   :  { %454 = vmatpush.bf16.msra.mxu0 %v762_v18  ;;  %v52_v48 = vmax.f32 %v44_v34, %v48_v37  ;;  %v867_v53 = vld [vmem:[#allocation2 + $0xe8] sm:$0xf0]  ;;  %v1115_v57 = vld [vmem:[#allocation2 + $0x164] sm:$0xf]  ;;  %v806_v2 = vor.u32 %v1083_v47, %v803_v51  ;;  %v1081_v5 = vld [vmem:[#allocation2 + $0x54] sm:$0xf] }
  0x21   :  { %467 = vmatpush.bf16.msra.mxu1 %v826_v23  ;;  %v53_v55 = vmax.f32 %v45_v39, %v49_v44  ;;  %v931_v58 = vld [vmem:[#allocation2 + $0x168] sm:$0xf0]  ;;  %v1131_v61 = vld [vmem:[#allocation2 + $0x1e4] sm:$0xf]  ;;  %v1243_v63 = vpack.c.bf16 %v50_v54, %v50_v54  ;;  %v870_v3 = vor.u32 %v1099_v52, %v867_v53  ;;  %v795_v6 = vld [vmem:[#allocation2 + $0x58] sm:$0xf0] }
  0x22   :  { %480 = vmatpush.bf16.msra.mxu2 %v890_v24  ;;  %v1238_v59 = vpack.c.bf16 %v52_v48, %v52_v48  ;;  %v43_v60 = vld [vmem:[%s1323_s0 + $0x8] sm:$0xff]  ;;  %v934_v4 = vor.u32 %v1115_v57, %v931_v58  ;;  %v1097_v7 = vld [vmem:[#allocation2 + $0xd4] sm:$0xf]  ;;  %v859_v10 = vld [vmem:[#allocation2 + $0xd8] sm:$0xf0]  ;;  %v798_v16 = vor.u32 %v1081_v5, %v795_v6  ;;  %vm744_vm5 = vcmask 7168  }
  0x23   :  { %493 = vmatpush.bf16.msra.mxu3 %v954_v28  ;;  %v995_v62 = vld [vmem:[#allocation2 + $0x1e8] sm:$0xf0]  ;;  %v1245_v0 = vpack.c.bf16 %v53_v55, %v53_v55  ;;  %v47_v1 = vmul.f32 0.01, %v43_v60  ;;  %v1113_v11 = vld [vmem:[#allocation2 + $0x154] sm:$0xf]  ;;  %v862_v17 = vor.u32 %v1097_v7, %v859_v10 }
  0x24   :  { %455 = vmatpush.bf16.msra.mxu0 %v754_v35  ;;  %v998_v9 = vor.u32 %v1131_v61, %v995_v62  ;;  %v923_v12 = vld [vmem:[#allocation2 + $0x158] sm:$0xf0]  ;;  %v1129_v13 = vld [vmem:[#allocation2 + $0x1d4] sm:$0xf]  ;;  %v1079_v19 = vld [vmem:[#allocation2 + $0x44] sm:$0xf] }
  0x25   :  { %468 = vmatpush.bf16.msra.mxu1 %v818_v40  ;;  %v51_v8 = vmax.f32 %v43_v60, %v47_v1  ;;  %v987_v14 = vld [vmem:[#allocation2 + $0x1d8] sm:$0xf0]  ;;  %v926_v18 = vor.u32 %v1113_v11, %v923_v12  ;;  %v787_v20 = vld [vmem:[#allocation2 + $0x48] sm:$0xf0]  ;;  %v1095_v21 = vld [vmem:[#allocation2 + $0xc4] sm:$0xf] }
  0x26   :  { %481 = vmatpush.bf16.msra.mxu2 %v882_v41  ;;  %v990_v22 = vor.u32 %v1129_v13, %v987_v14  ;;  %v851_v23 = vld [vmem:[#allocation2 + $0xc8] sm:$0xf0]  ;;  %v1111_v24 = vld [vmem:[#allocation2 + $0x144] sm:$0xf]  ;;  %v790_v28 = vor.u32 %v1079_v19, %v787_v20  ;;  %v1077_v31 = vld [vmem:[#allocation2 + $0x34] sm:$0xf] }
  0x27   :  { %494 = vmatpush.bf16.msra.mxu3 %v946_v45  ;;  %456 = vmatmul.bf16.vlgmr.msra.gmra.mxu0 %v1243_v63  ;;  %v1250_v15 = vpack.c.bf16 %v51_v8, %v51_v8  ;;  %v915_v25 = vld [vmem:[#allocation2 + $0x148] sm:$0xf0]  ;;  %v1127_v26 = vld [vmem:[#allocation2 + $0x1c4] sm:$0xf]  ;;  %v854_v29 = vor.u32 %v1095_v21, %v851_v23  ;;  %v779_v32 = vld [vmem:[#allocation2 + $0x38] sm:$0xf0] }
  0x28   :  { %500 = vmatpush.bf16.msrb.mxu0 %v814_v46  ;;  %v979_v27 = vld [vmem:[#allocation2 + $0x1c8] sm:$0xf0]  ;;  %v918_v30 = vor.u32 %v1111_v24, %v915_v25  ;;  %v1093_v33 = vld [vmem:[#allocation2 + $0xb4] sm:$0xf]  ;;  %v843_v35 = vld [vmem:[#allocation2 + $0xb8] sm:$0xf0]  ;;  %v782_v40 = vor.u32 %v1077_v31, %v779_v32 }
  0x29   :  { %513 = vmatpush.bf16.msrb.mxu1 %v878_v49  ;;  %482 = vmatmul.bf16.vlgmr.msra.gmra.mxu2 %v1238_v59  ;;  %v982_v34 = vor.u32 %v1127_v26, %v979_v27  ;;  %v1109_v36 = vld [vmem:[#allocation2 + $0x134] sm:$0xf]  ;;  %v907_v37 = vld [vmem:[#allocation2 + $0x138] sm:$0xf0]  ;;  %v1075_v41 = vld [vmem:[#allocation2 + $0x24] sm:$0xf]  ;;  %v846_v42 = vor.u32 %v1093_v33, %v843_v35 }
  0x2a   :  { %526 = vmatpush.bf16.msrb.mxu2 %v942_v50  ;;  %495 = vmatmul.bf16.vlgmr.msra.gmra.mxu3 %v1245_v0  ;;  %v1125_v38 = vld [vmem:[#allocation2 + $0x1b4] sm:$0xf]  ;;  %v971_v39 = vld [vmem:[#allocation2 + $0x1b8] sm:$0xf0]  ;;  %v910_v43 = vor.u32 %v1109_v36, %v907_v37  ;;  %v771_v44 = vld [vmem:[#allocation2 + $0x28] sm:$0xf0] }
  0x2b   :  { %539 = vmatpush.bf16.msrb.mxu3 %v1006_v56  ;;  %469 = vmatmul.bf16.vlgmr.msra.gmra.mxu1 %v1250_v15  ;;  %v1091_v45 = vld [vmem:[#allocation2 + $0xa4] sm:$0xf]  ;;  %v974_v46 = vor.u32 %v1125_v38, %v971_v39  ;;  %v835_v47 = vld [vmem:[#allocation2 + $0xa8] sm:$0xf0]  ;;  %v774_v52 = vor.u32 %v1075_v41, %v771_v44  ;;  %v1073_v55 = vld [vmem:[#allocation2 + $0x14] sm:$0xf] }
  0x2c   :  { %501 = vmatpush.bf16.msrb.mxu0 %v806_v2  ;;  %v1107_v48 = vld [vmem:[#allocation2 + $0x124] sm:$0xf]  ;;  %v899_v49 = vld [vmem:[#allocation2 + $0x128] sm:$0xf0]  ;;  %v838_v53 = vor.u32 %v1091_v45, %v835_v47  ;;  %v763_v56 = vld [vmem:[#allocation2 + $0x18] sm:$0xf0] }
  0x2d   :  { %514 = vmatpush.bf16.msrb.mxu1 %v870_v3  ;;  %v1123_v50 = vld [vmem:[#allocation2 + $0x1a4] sm:$0xf]  ;;  %v963_v51 = vld [vmem:[#allocation2 + $0x1a8] sm:$0xf0]  ;;  %v902_v54 = vor.u32 %v1107_v48, %v899_v49  ;;  %v1089_v57 = vld [vmem:[#allocation2 + $0x94] sm:$0xf]  ;;  %v766_v3 = vor.u32 %v1073_v55, %v763_v56 }
  0x2e   :  { %527 = vmatpush.bf16.msrb.mxu2 %v934_v4  ;;  %v966_v58 = vor.u32 %v1123_v50, %v963_v51  ;;  %v827_v60 = vld [vmem:[#allocation2 + $0x98] sm:$0xf0]  ;;  %v1105_v61 = vld [vmem:[#allocation2 + $0x114] sm:$0xf]  ;;  %v1071_v6 = vld [vmem:[#allocation2 + $0x4] sm:$0xf] }
  0x2f   :  { %540 = vmatpush.bf16.msrb.mxu3 %v998_v9  ;;  %v891_v62 = vld [vmem:[#allocation2 + $0x118] sm:$0xf0]  ;;  %v1121_v1 = vld [vmem:[#allocation2 + $0x194] sm:$0xf]  ;;  %v830_v4 = vor.u32 %v1089_v57, %v827_v60  ;;  %v755_v7 = vld [vmem:[#allocation2 + $0x8] sm:$0xf0] }
  0x30   :  { %502 = vmatpush.bf16.msrb.mxu0 %v798_v16  ;;  %v955_v2 = vld [vmem:[#allocation2 + $0x198] sm:$0xf0]  ;;  %v894_v5 = vor.u32 %v1105_v61, %v891_v62  ;;  %v1087_v8 = vld [vmem:[#allocation2 + $0x84] sm:$0xf]  ;;  %v819_v10 = vld [vmem:[#allocation2 + $0x88] sm:$0xf0]  ;;  %v758_v16 = vor.u32 %v1071_v6, %v755_v7 }
  0x31   :  { %515 = vmatpush.bf16.msrb.mxu1 %v862_v17  ;;  %v958_v9 = vor.u32 %v1121_v1, %v955_v2  ;;  %v1103_v11 = vld [vmem:[#allocation2 + $0x104] sm:$0xf]  ;;  %v883_v12 = vld [vmem:[#allocation2 + $0x108] sm:$0xf0]  ;;  %v822_v17 = vor.u32 %v1087_v8, %v819_v10  ;;  %v1142_v20 = vld [vmem:[%s1328_s5 + $0x38] sm:$0xff] }
  0x32   :  { %528 = vmatpush.bf16.msrb.mxu2 %v926_v18  ;;  %v1119_v13 = vld [vmem:[#allocation2 + $0x184] sm:$0xf]  ;;  %v947_v14 = vld [vmem:[#allocation2 + $0x188] sm:$0xf0]  ;;  %v886_v18 = vor.u32 %v1103_v11, %v883_v12  ;;  %v1141_v21 = vld [vmem:[%s1328_s5 + $0x30] sm:$0xff] }
  0x33   :  { %541 = vmatpush.bf16.msrb.mxu3 %v990_v22  ;;  %v950_v19 = vor.u32 %v1119_v13, %v947_v14  ;;  %v1140_v22 = vld [vmem:[%s1328_s5 + $0x28] sm:$0xff]  ;;  %v1139_v23 = vld [vmem:[%s1328_s5 + $0x20] sm:$0xff]  ;;  %v1149_v25 = vld [vmem:[%s1328_s5 + $0x70] sm:$0xff] }
  0x34   :  { %503 = vmatpush.bf16.msrb.mxu0 %v790_v28  ;;  %v1135_v24 = vld [vmem:[%s1328_s5] sm:$0xff]  ;;  %v1148_v26 = vld [vmem:[%s1328_s5 + $0x68] sm:$0xff]  ;;  %v1145_v35 = vld [vmem:[%s1328_s5 + $0x50] sm:$0xff] }
  0x35   :  { %516 = vmatpush.bf16.msrb.mxu1 %v854_v29  ;;  %v122_v27 = vld [vmem:[%s1327_s4] sm:$0x3]  ;;  %v1144_v41 = vld [vmem:[%s1328_s5 + $0x48] sm:$0xff] }
  0x36   :  { %529 = vmatpush.bf16.msrb.mxu2 %v918_v30  ;;  %v1147_v28 = vld [vmem:[%s1328_s5 + $0x60] sm:$0xff]  ;;  %v124_v29 = vperm.slane %v122_v27, 0  ;;  %v1146_v30 = vld [vmem:[%s1328_s5 + $0x58] sm:$0xff]  ;;  %v125_v51 = vperm.slane %v122_v27, 1  ;;  %v557_v2 = vld [vmem:[%s1325_s2 + $0x8] sm:$0xff] }
  0x37   :  { %542 = vmatpush.bf16.msrb.mxu3 %v982_v34  ;;  %v720_v8 = vld [vmem:[%s1324_s1] sm:$0xff] }
  0x38   :  { %504 = vmatpush.bf16.msrb.mxu0 %v782_v40  ;;  %v1154_v12 = vld [vmem:[%s1329_s6] ss:$0 sm:$0xff] }
  0x39   :  { %517 = vmatpush.bf16.msrb.mxu1 %v846_v42 }
  0x3a   :  { %530 = vmatpush.bf16.msrb.mxu2 %v910_v43  ;;  %v556_v43 = vld [vmem:[%s1325_s2] sm:$0xff] }
  0x3b   :  { %543 = vmatpush.bf16.msrb.mxu3 %v974_v46  ;;  %v1143_v46 = vld [vmem:[%s1328_s5 + $0x40] sm:$0xff] }
  0x3c   :  { %505 = vmatpush.bf16.msrb.mxu0 %v774_v52 }
  0x3d   :  { %518 = vmatpush.bf16.msrb.mxu1 %v838_v53 }
  0x3e   :  { %531 = vmatpush.bf16.msrb.mxu2 %v902_v54 }
  0x3f   :  { %544 = vmatpush.bf16.msrb.mxu3 %v966_v58 }
  0x40   :  { %506 = vmatpush.bf16.msrb.mxu0 %v766_v3 }
  0x41   :  { %519 = vmatpush.bf16.msrb.mxu1 %v830_v4 }
  0x42   :  { %532 = vmatpush.bf16.msrb.mxu2 %v894_v5 }
  0x43   :  { %545 = vmatpush.bf16.msrb.mxu3 %v958_v9  ;;  %v726_v9 = vsel %vm722_vm0, %v720_v8, 0.0 }
  0x44   :  { %507 = vmatpush.bf16.msrb.mxu0 %v758_v16  ;;  %727 = vadd.xlane.f32.xlu0 %v726_v9 }
  0x45   :  { %520 = vmatpush.bf16.msrb.mxu1 %v822_v17 }
  0x46   :  { %533 = vmatpush.bf16.msrb.mxu2 %v886_v18 }
  0x47   :  { %546 = vmatpush.bf16.msrb.mxu3 %v950_v19  ;;  %508 = vmatmul.bf16.vlgmr.msrb.gmra.mxu0 %v1243_v63  ;;  %v1138_v63 = vld [vmem:[%s1328_s5 + $0x18] sm:$0xff] }
  0x48   :  { %694 = vmatpush.bf16.msra.mxu0 %v1142_v20  ;;  %521 = vmatmul.bf16.vlgmr.msrb.gmra.mxu1 %v1250_v15  ;;  %v1150_v15 = vld [vmem:[%s1328_s5 + $0x78] sm:$0xff] }
  0x49   :  { %534 = vmatmul.bf16.vlgmr.msrb.gmra.mxu2 %v1238_v59  ;;  %v1137_v59 = vld [vmem:[%s1328_s5 + $0x10] sm:$0xff]  ;;  %707 = vmatpush.bf16.msra.mxu1 %v1150_v15 }
  0x4a   :  { %547 = vmatmul.bf16.vlgmr.msrb.gmra.mxu3 %v1245_v0  ;;  %v1136_v0 = vld [vmem:[%s1328_s5 + $0x8] sm:$0xff] }
  0x4c   :  { %695 = vmatpush.bf16.msra.mxu0 %v1141_v21 }
  0x4d   :  { %708 = vmatpush.bf16.msra.mxu1 %v1149_v25 }
  0x50   :  { %696 = vmatpush.bf16.msra.mxu0 %v1140_v22 }
  0x51   :  { %709 = vmatpush.bf16.msra.mxu1 %v1148_v26 }
  0x54   :  { %697 = vmatpush.bf16.msra.mxu0 %v1139_v23 }
  0x55   :  { %710 = vmatpush.bf16.msra.mxu1 %v1147_v28 }
  0x58   :  { %698 = vmatpush.bf16.msra.mxu0 %v1138_v63 }
  0x59   :  { %711 = vmatpush.bf16.msra.mxu1 %v1146_v30 }
  0x5c   :  { %699 = vmatpush.bf16.msra.mxu0 %v1137_v59 }
  0x5d   :  { %712 = vmatpush.bf16.msra.mxu1 %v1145_v35 }
  0x60   :  { %700 = vmatpush.bf16.msra.mxu0 %v1136_v0 }
  0x61   :  { %713 = vmatpush.bf16.msra.mxu1 %v1144_v41 }
  0x64   :  { %701 = vmatpush.bf16.msra.mxu0 %v1135_v24 }
  0x65   :  { %714 = vmatpush.bf16.msra.mxu1 %v1143_v46 }
  0xa4   :  { %v457_v31 = vpop.f32.mrf.mxu0 }
  0xa5   :  { %v458_v32 = vadd.f32 %v457_v31, %v124_v29 }
  0xa8   :  { %v470_v33 = vpop.f32.mrf.mxu1 }
  0xa9   :  { %v471_v34 = vadd.f32 %v470_v33, %v458_v32 }
  0xac   :  { %v483_v36 = vpop.f32.mrf.mxu2  ;;  %v459_v40 = vpop.f32.mrf.mxu0 }
  0xad   :  { %v484_v37 = vadd.f32 %v483_v36, %v471_v34  ;;  %v496_v38 = vpop.f32.mrf.mxu3 }
  0xaf   :  { %v497_v39 = vadd.f32 %v496_v38, %v484_v37 }
  0xb0   :  { %v472_v44 = vpop.f32.mrf.mxu1 }
  0xb1   :  { %v552_v42 = vmul.f32 0.01, %v497_v39 }
  0xb3   :  { %v554_v45 = vmax.f32 %v497_v39, %v552_v42 }
  0xb4   :  { %v485_v47 = vpop.f32.mrf.mxu2 }
  0xb5   :  { %v558_v48 = vmul.f32 %v556_v43, %v554_v45  ;;  %v498_v49 = vpop.f32.mrf.mxu3 }
  0xb7   :  { %v560_v50 = vpack.c.bf16 %v558_v48, %v558_v48  ;;  %v728_v20 = vpop.xlane.xlu0 %727 }
  0xb8   :  { %1155 = vrcp.f32 %v728_v20  ;;  %vm734_vm1 = vweird.f32 %v728_v20  ;;  %v740_v59 = vand.u32 2147483648, %v728_v20  ;;  %v738_v15 = vand.u32 2147483647, %v728_v20 }
  0xb9   :  { %702 = vmatmul.bf16.vlgmr.msra.gmra.mxu0 %v560_v50 }
  0xba   :  { %v741_v24 = vor.u32 1.1754944e-38, %v740_v59  ;;  %vm739_vm4 = vcmp.eq.f32.partialorder %v738_v15, 8.507059e+37 }
  0xbe   :  { %v1156_v21 = vpop.eup %1155 }
  0xbf   :  { %v730_v22 = vmul.f32 %v1156_v21, %v728_v20  ;;  %vm735_vm2 = vweird.f32 %v1156_v21 }
  0xc0   :  { %vm736_vm3 = vmor %vm734_vm1, %vm735_vm2 }
  0xc1   :  { %v731_v23 = vsub.f32 1.0, %v730_v22 }
  0xc3   :  { %v732_v63 = vmul.f32 %v1156_v21, %v731_v23 }
  0xc4   :  { %v509_v52 = vpop.f32.mrf.mxu0 }
  0xc5   :  { %v510_v53 = vadd.f32 %v509_v52, %v125_v51  ;;  %v522_v54 = vpop.f32.mrf.mxu1  ;;  %v733_v0 = vadd.f32 %v1156_v21, %v732_v63 }
  0xc7   :  { %v523_v55 = vadd.f32 %v522_v54, %v510_v53  ;;  %v737_v25 = vsel %vm736_vm3, %v1156_v21, %v733_v0 }
  0xc8   :  { %v742_v26 = vsel %vm739_vm4, %v741_v24, %v737_v25 }
  0xcc   :  { %v535_v56 = vpop.f32.mrf.mxu2  ;;  %v511_v60 = vpop.f32.mrf.mxu0 }
  0xcd   :  { %v536_v57 = vadd.f32 %v535_v56, %v523_v55  ;;  %v548_v58 = vpop.f32.mrf.mxu3  ;;  %v524_v61 = vpop.f32.mrf.mxu1 }
  0xcf   :  { %v549_v62 = vadd.f32 %v548_v58, %v536_v57 }
  0xd1   :  { %v553_v1 = vmul.f32 0.01, %v549_v62 }
  0xd3   :  { %v555_v3 = vmax.f32 %v549_v62, %v553_v1 }
  0xd4   :  { %v537_v4 = vpop.f32.mrf.mxu2 }
  0xd5   :  { %v559_v5 = vmul.f32 %v557_v2, %v555_v3  ;;  %v550_v6 = vpop.f32.mrf.mxu3 }
  0xd7   :  { %v561_v7 = vpack.c.bf16 %v559_v5, %v559_v5 }
  0xd9   :  { %715 = vmatmul.bf16.vlgmr.msra.gmra.mxu1 %v561_v7 }
 0x136   :  { %v703_v10 = vpop.f32.mrf.mxu0 }
 0x137   :  { %v704_v13 = vadd.f32 %v1154_v12, %v703_v10 }
 0x13e   :  { %v705_v11 = vpop.f32.mrf.mxu0 }
 0x156   :  { %v716_v14 = vpop.f32.mrf.mxu1 }
 0x157   :  { %v717_v16 = vadd.f32 %v716_v14, %v704_v13 }
 0x159   :  { %v721_v17 = vmul.f32 %v720_v8, %v717_v16 }
 0x15b   :  { %v723_v18 = vsel %vm722_vm0, %v721_v17, 0.0 }
 0x15c   :  { %724 = vadd.xlane.f32.xlu0 %v723_v18 }
 0x15e   :  { %v718_v19 = vpop.f32.mrf.mxu1 }
 0x1cf   :  { %v725_v27 = vpop.xlane.xlu0 %724 }
 0x1d0   :  { %v743_v28 = vmul.f32 %v742_v26, %v725_v27 }
 0x1d2   :  { %745 = vst.msk [vmem:[%s1330_s7] sm:$0xff] %vm744_vm5, %v743_v28 }
 0x1d3   :  { %750 = vsyncpa [#allocation3], 1 }

</bundles_post_ra>
